<compile_context>
chip_gen: v7x
topology: tpu7x:2x2x1
jax: 0.10.0
libtpu: 0.0.40
codegen_flags: <defaults>
</compile_context>

<pallas_src>
import math
import functools

import jax
import jax.numpy as jnp
from jax import lax
from jax.experimental import pallas as pl
from jax.experimental.pallas import tpu as pltpu

_NEG_BIG = -1e30  # finite "minus infinity" for the causal mask


def _default_vmem_limit():
    """~75% of physical VMEM, capped at 100 MiB (generation-aware: v7x has 64 MiB)."""
    cap = 128 * 1024 * 1024
    try:
        info = pltpu.get_tpu_info()
        cap = int(getattr(info, "vmem_capacity_bytes", cap))
    except Exception:
        pass
    return min((cap * 3) // 4, 100 * 1024 * 1024)


def _const_spec(shape):
    """BlockSpec for a grid-constant operand; single-buffered to save VMEM."""
    index_map = lambda *_: (0,) * len(shape)
    try:
        return pl.BlockSpec(shape, index_map, pipeline_mode=pl.Buffered(1))
    except Exception:  # older jax without pipeline_mode: fall back to default buffering
        return pl.BlockSpec(shape, index_map)


# ---------------------------------------------------------------------------
# Kernel 1: fused QKV projection, output in head-major (H, TQ, D) layout.
# The 1/sqrt(D) softmax scale is folded into q here (once per element) instead of
# scaling the (H, TQ, TK) score tile on every KV step in kernel 2.
# ---------------------------------------------------------------------------
def _qkv_kernel(x_ref, w_ref, b_ref, q_ref, k_ref, v_ref, *, n_head, scale):
    x = x_ref[0]                                                 # (TQ, C) bf16
    qkv = jnp.dot(x, w_ref[...],                                 # (TQ, 3C) f32 acc
                  preferred_element_type=jnp.float32) + b_ref[...]
    tq, c3 = qkv.shape
    c = c3 // 3
    h = n_head
    d = c // h

    def to_heads(mat):                                           # (TQ, C) -> (H, TQ, D)
        return jnp.transpose(mat.reshape(tq, h, d), (1, 0, 2))

    q_ref[0] = to_heads(qkv[:, 0 * c:1 * c] * scale).astype(q_ref.dtype)
    k_ref[0] = to_heads(qkv[:, 1 * c:2 * c]).astype(k_ref.dtype)
    v_ref[0] = to_heads(qkv[:, 2 * c:3 * c]).astype(v_ref.dtype)


# ---------------------------------------------------------------------------
# Kernel 2: flash (online-softmax) causal attention + fused output projection.
# Grid (B, T//TQ, T//TK) with the KV axis last ("arbitrary"). Running max/sum/acc
# live in f32 VMEM scratch; no (H, T, T) score tensor is ever materialized.
# ---------------------------------------------------------------------------
def _flash_attn_kernel(q_ref, k_ref, v_ref, wo_ref, bo_ref, o_ref,
                       m_sc, l_sc, acc_sc, *, tq, tk):
    i = pl.program_id(1)   # query-tile index
    j = pl.program_id(2)   # kv-tile index (reduction axis, runs last / in order)

    first_q = i * tq
    last_q = first_q + (tq - 1)
    first_k = j * tk
    last_k = first_k + (tk - 1)

    @pl.when(j == 0)
    def _init():
        m_sc[...] = jnp.full_like(m_sc, _NEG_BIG)
        l_sc[...] = jnp.zeros_like(l_sc)
        acc_sc[...] = jnp.zeros_like(acc_sc)

    def _scores():
        # Batched over heads on the MXU, f32 accumulation. Scale already folded into q.
        return lax.dot_general(q_ref[0], k_ref[0], (((2,), (2,)), ((0,), (0,))),
                               preferred_element_type=jnp.float32)   # (H, TQ, TK)

    def _online_update(s):
        v = v_ref[0]                                                  # (H, TK, D) bf16
        m_prev = m_sc[...]                                            # (H, TQ, 1)
        m_new = jnp.maximum(m_prev, jnp.max(s, axis=-1, keepdims=True))
        alpha = jnp.exp(m_prev - m_new)
        p = jnp.exp(s - m_new)                                        # (H, TQ, TK) f32
        l_sc[...] = alpha * l_sc[...] + jnp.sum(p, axis=-1, keepdims=True)
        pv = lax.dot_general(p.astype(v.dtype), v, (((2,), (1,)), ((0,), (0,))),
                             preferred_element_type=jnp.float32)      # (H, TQ, D)
        acc_sc[...] = alpha * acc_sc[...] + pv
        m_sc[...] = m_new

    # Fully-visible interior tile (every key index <= every query index): no mask.
    @pl.when(last_k <= first_q)
    def _interior():
        _online_update(_scores())

    # Tile straddles the causal diagonal: build and apply the mask.
    @pl.when(jnp.logical_and(first_k <= last_q, last_k > first_q))
    def _diagonal():
        rows = lax.broadcasted_iota(jnp.int32, (tq, tk), 0) + first_q
        cols = lax.broadcasted_iota(jnp.int32, (tq, tk), 1) + first_k
        s = jnp.where((cols <= rows)[None, :, :], _scores(), _NEG_BIG)
        _online_update(s)

    # Fully-future tiles (first_k > last_q) do nothing; their K/V DMA is deduped by
    # the clamped index_map in the wrapper.

    @pl.when(j == pl.num_programs(2) - 1)
    def _finalize():
        h, tq_, d = acc_sc.shape
        y = acc_sc[...] * pl.reciprocal(l_sc[...], approx=True)      # (H, TQ, D) f32
        y = jnp.transpose(y, (1, 0, 2)).reshape(tq_, h * d)          # (TQ, C)
        out = jnp.dot(y.astype(jnp.bfloat16), wo_ref[...],
                      preferred_element_type=jnp.float32) + bo_ref[...]
        o_ref[0] = out.astype(o_ref.dtype)


# ---------------------------------------------------------------------------
# Wrapper
# ---------------------------------------------------------------------------
def self_attention_forward(x, params, n_head, *, q_tile=256, kv_tile=256,
                           vmem_limit_bytes=None, out_dtype=None):
    """x: (B, T, C). params: dict from init_params (x @ W layout)."""
    B, T, C = x.shape
    H = n_head
    assert C % H == 0, "n_embd must be divisible by n_head"
    D = C // H

    TQ = min(q_tile, T)
    TK = min(kv_tile, T)
    # Keep at least 2 parallel grid steps so both v7x TensorCores get work.
    while B * (T // TQ) < 2 and TQ > 128 and TQ % 2 == 0 and T % (TQ // 2) == 0:
        TQ //= 2
    assert T % TQ == 0 and T % TK == 0, "T must be divisible by the tile sizes"

    if vmem_limit_bytes is None:
        vmem_limit_bytes = _default_vmem_limit()
    if out_dtype is None:
        out_dtype = x.dtype

    # bf16 activations / weights at the boundary (halve DMA bytes); biases stay f32.
    x_bf16 = x.astype(jnp.bfloat16)
    w_qkv = params["w_qkv"].astype(jnp.bfloat16)   # (C, 3C)
    b_qkv = params["b_qkv"].astype(jnp.float32)    # (1, 3C)
    w_o = params["w_o"].astype(jnp.bfloat16)       # (C, C)
    b_o = params["b_o"].astype(jnp.float32)        # (1, C)

    scale = 1.0 / math.sqrt(D)

    # ---- kernel 1: QKV projection -> head-major q, k, v (bf16) ----
    head_spec = pl.BlockSpec((1, H, TQ, D), lambda b, i: (b, 0, i, 0))
    q, k, v = pl.pallas_call(
        functools.partial(_qkv_kernel, n_head=H, scale=scale),
        out_shape=(jax.ShapeDtypeStruct((B, H, T, D), jnp.bfloat16),) * 3,
        grid_spec=pltpu.PrefetchScalarGridSpec(
            num_scalar_prefetch=0,
            grid=(B, T // TQ),
            in_specs=[
                pl.BlockSpec((1, TQ, C), lambda b, i: (b, i, 0)),   # x tile (bf16)
                _const_spec((C, 3 * C)),                            # W_qkv (resident)
                _const_spec((1, 3 * C)),                            # b_qkv
            ],
            out_specs=(head_spec, head_spec, head_spec),
        ),
        compiler_params=pltpu.CompilerParams(
            dimension_semantics=("parallel", "parallel"),
            vmem_limit_bytes=vmem_limit_bytes),
    )(x_bf16, w_qkv, b_qkv)

    # ---- kernel 2: flash attention + fused output projection ----
    # Causal DMA dedup: clamp the kv block index to the last tile that can contribute
    # to query tile i; repeated block indices are not re-fetched by Pallas, so the
    # skipped (fully-future) steps cost no K/V HBM traffic.
    def kv_map(b, i, j):
        last_needed = (i * TQ + (TQ - 1)) // TK
        return (b, 0, jnp.minimum(j, last_needed), 0)

    out = pl.pallas_call(
        functools.partial(_flash_attn_kernel, tq=TQ, tk=TK),
        out_shape=jax.ShapeDtypeStruct((B, T, C), out_dtype),
        grid_spec=pltpu.PrefetchScalarGridSpec(
            num_scalar_prefetch=0,
            grid=(B, T // TQ, T // TK),
            in_specs=[
                pl.BlockSpec((1, H, TQ, D), lambda b, i, j: (b, 0, i, 0)),  # q
                pl.BlockSpec((1, H, TK, D), kv_map),                        # k
                pl.BlockSpec((1, H, TK, D), kv_map),                        # v
                _const_spec((C, C)),                                        # W_o
                _const_spec((1, C)),                                        # b_o
            ],
            out_specs=pl.BlockSpec((1, TQ, C), lambda b, i, j: (b, i, 0)),
            scratch_shapes=[
                pltpu.VMEM((H, TQ, 1), jnp.float32),   # running max (pads to 128 lanes)
                pltpu.VMEM((H, TQ, 1), jnp.float32),   # running sum (pads to 128 lanes)
                pltpu.VMEM((H, TQ, D), jnp.float32),   # output accumulator
            ],
        ),
        compiler_params=pltpu.CompilerParams(
            dimension_semantics=("parallel", "parallel", "arbitrary"),
            vmem_limit_bytes=vmem_limit_bytes),
    )(q, k, v, w_o, b_o)
    return out


# ---------------------------------------------------------------------------
# Deterministic parameter init (nn.Linear weights pre-transposed to x @ W layout)
# ---------------------------------------------------------------------------
def init_params(key, n_embd):
    C = n_embd
    ks = jax.random.split(key, 4)
    s = 0.02
    return {
        "w_qkv": (s * jax.random.normal(ks[0], (C, 3 * C))).astype(jnp.float32),
        "b_qkv": (s * jax.random.normal(ks[1], (1, 3 * C))).astype(jnp.float32),
        "w_o":   (s * jax.random.normal(ks[2], (C, C))).astype(jnp.float32),
        "b_o":   (s * jax.random.normal(ks[3], (1, C))).astype(jnp.float32),
    }


# ---------------------------------------------------------------------------
# Pure-JAX reference (f32) for a correctness check
# ---------------------------------------------------------------------------
def attention_reference(x, p, n_head):
    B, T, C = x.shape
    H, D = n_head, C // n_head
    qkv = x @ p["w_qkv"] + p["b_qkv"]
    q, k, v = jnp.split(qkv, 3, axis=-1)
    q = q.reshape(B, T, H, D).transpose(0, 2, 1, 3)
    k = k.reshape(B, T, H, D).transpose(0, 2, 1, 3)
    v = v.reshape(B, T, H, D).transpose(0, 2, 1, 3)
    s = jnp.einsum('bhtd,bhsd->bhts', q, k) / math.sqrt(D)
    mask = jnp.tril(jnp.ones((T, T), bool))
    s = jnp.where(mask, s, -jnp.inf)
    a = jax.nn.softmax(s, axis=-1)
    y = jnp.einsum('bhts,bhsd->bhtd', a, v).transpose(0, 2, 1, 3).reshape(B, T, C)
    return y @ p["w_o"] + p["b_o"]


if __name__ == "__main__":
    # small config consistent with the module: n_embd=32, n_head=4, seq=8, batch=2
    B, T, C, H = 2, 8, 32, 4

    key = jax.random.PRNGKey(0)
    kx, kp = jax.random.split(key)
    x = jax.random.normal(kx, (B, T, C), dtype=jnp.float32)
    params = init_params(kp, C)

    out = jax.block_until_ready(self_attention_forward(x, params, n_head=H))
    ref = attention_reference(x, params, n_head=H)

    assert out.shape == (B, T, C)
    # bf16 MXU inputs with f32 accumulation -> loose-ish tolerance vs f32 reference
    assert jnp.allclose(out, ref, atol=2e-2, rtol=2e-2), (
        f"mismatch vs reference, max abs err = {float(jnp.max(jnp.abs(out - ref)))}")

    print("KERNEL_OK")
</pallas_src>

<mosaic_0001>
module attributes {stable_mosaic.version = 11 : i64} {
  func.func @_qkv_kernel(%arg0: i32, %arg1: i32, %arg2: memref<1x8x32xbf16, #tpu.memory_space<vmem>>, %arg3: memref<32x96xbf16, #tpu.memory_space<vmem>>, %arg4: memref<1x96xf32, #tpu.memory_space<vmem>>, %arg5: memref<1x4x8x8xbf16, #tpu.memory_space<vmem>>, %arg6: memref<1x4x8x8xbf16, #tpu.memory_space<vmem>>, %arg7: memref<1x4x8x8xbf16, #tpu.memory_space<vmem>>) attributes {dimension_semantics = [#tpu.dimension_semantics<parallel>, #tpu.dimension_semantics<parallel>], iteration_bounds = array<i64: 2, 1>, scalar_prefetch = 0 : i64, scratch_operands = 0 : i64, tpu.core_type = #tpu.core_type<tc>, window_params = [{transform_indices = @transform_0, window_bounds = array<i64: 1, 8, 32>}, {pipeline_mode = #tpu.pipeline_mode<synchronous>, transform_indices = @transform_1, window_bounds = array<i64: 32, 96>}, {pipeline_mode = #tpu.pipeline_mode<synchronous>, transform_indices = @transform_2, window_bounds = array<i64: 1, 96>}, {transform_indices = @transform_3, window_bounds = array<i64: 1, 4, 8, 8>}, {transform_indices = @transform_4, window_bounds = array<i64: 1, 4, 8, 8>}, {transform_indices = @transform_5, window_bounds = array<i64: 1, 4, 8, 8>}]} {
    %c0 = arith.constant 0 : index
    %c0_0 = arith.constant 0 : index
    %c0_1 = arith.constant 0 : index
    %0 = vector.load %arg2[%c0, %c0_0, %c0_1] : memref<1x8x32xbf16, #tpu.memory_space<vmem>>, vector<1x8x32xbf16>
    %1 = vector.shape_cast %0 : vector<1x8x32xbf16> to vector<8x32xbf16>
    %c0_2 = arith.constant 0 : index
    %c0_3 = arith.constant 0 : index
    %2 = vector.load %arg3[%c0_2, %c0_3] : memref<32x96xbf16, #tpu.memory_space<vmem>>, vector<32x96xbf16>
    %cst = arith.constant dense<0.000000e+00> : vector<8x96xf32>
    %3 = tpu.matmul %1, %2, %cst {dimension_numbers = #tpu.dot_dimension_numbers<[1], [0], [0], [1], [0, 0, 1, 1], [], []>} : vector<8x32xbf16>, vector<32x96xbf16>, vector<8x96xf32> -> vector<8x96xf32>
    %c0_4 = arith.constant 0 : index
    %c0_5 = arith.constant 0 : index
    %4 = vector.load %arg4[%c0_4, %c0_5] : memref<1x96xf32, #tpu.memory_space<vmem>>, vector<1x96xf32>
    %5 = vector.broadcast %4 : vector<1x96xf32> to vector<8x96xf32>
    %6 = arith.addf %3, %5 : vector<8x96xf32>
    %7 = vector.extract_strided_slice %6 {offsets = [0, 0], sizes = [8, 32], strides = [1, 1]} : vector<8x96xf32> to vector<8x32xf32>
    %cst_6 = arith.constant 0.353553385 : f32
    %8 = vector.broadcast %cst_6 : f32 to vector<8x32xf32>
    %9 = arith.mulf %7, %8 : vector<8x32xf32>
    %10 = vector.shape_cast %9 : vector<8x32xf32> to vector<8x4x8xf32>
    %11 = tpu.transpose %10, [1, 0, 2] : vector<8x4x8xf32> -> vector<4x8x8xf32>
    %12 = arith.truncf %11 : vector<4x8x8xf32> to vector<4x8x8xbf16>
    %c0_7 = arith.constant 0 : index
    %c0_8 = arith.constant 0 : index
    %c0_9 = arith.constant 0 : index
    %c0_10 = arith.constant 0 : index
    %13 = vector.load %arg5[%c0_7, %c0_8, %c0_9, %c0_10] : memref<1x4x8x8xbf16, #tpu.memory_space<vmem>>, vector<1x4x8x8xbf16>
    %14 = vector.shape_cast %13 : vector<1x4x8x8xbf16> to vector<4x8x8xbf16>
    %15 = vector.shape_cast %12 : vector<4x8x8xbf16> to vector<1x4x8x8xbf16>
    tpu.vector_store %arg5[%c0_7, %c0_8, %c0_9, %c0_10], %15 {strides = array<i32>} : memref<1x4x8x8xbf16, #tpu.memory_space<vmem>>, vector<1x4x8x8xbf16>,
    %16 = vector.extract_strided_slice %6 {offsets = [0, 32], sizes = [8, 32], strides = [1, 1]} : vector<8x96xf32> to vector<8x32xf32>
    %17 = vector.shape_cast %16 : vector<8x32xf32> to vector<8x4x8xf32>
    %18 = tpu.transpose %17, [1, 0, 2] : vector<8x4x8xf32> -> vector<4x8x8xf32>
    %19 = arith.truncf %18 : vector<4x8x8xf32> to vector<4x8x8xbf16>
    %c0_11 = arith.constant 0 : index
    %c0_12 = arith.constant 0 : index
    %c0_13 = arith.constant 0 : index
    %c0_14 = arith.constant 0 : index
    %20 = vector.load %arg6[%c0_11, %c0_12, %c0_13, %c0_14] : memref<1x4x8x8xbf16, #tpu.memory_space<vmem>>, vector<1x4x8x8xbf16>
    %21 = vector.shape_cast %20 : vector<1x4x8x8xbf16> to vector<4x8x8xbf16>
    %22 = vector.shape_cast %19 : vector<4x8x8xbf16> to vector<1x4x8x8xbf16>
    tpu.vector_store %arg6[%c0_11, %c0_12, %c0_13, %c0_14], %22 {strides = array<i32>} : memref<1x4x8x8xbf16, #tpu.memory_space<vmem>>, vector<1x4x8x8xbf16>,
    %23 = vector.extract_strided_slice %6 {offsets = [0, 64], sizes = [8, 32], strides = [1, 1]} : vector<8x96xf32> to vector<8x32xf32>
    %24 = vector.shape_cast %23 : vector<8x32xf32> to vector<8x4x8xf32>
    %25 = tpu.transpose %24, [1, 0, 2] : vector<8x4x8xf32> -> vector<4x8x8xf32>
    %26 = arith.truncf %25 : vector<4x8x8xf32> to vector<4x8x8xbf16>
    %c0_15 = arith.constant 0 : index
    %c0_16 = arith.constant 0 : index
    %c0_17 = arith.constant 0 : index
    %c0_18 = arith.constant 0 : index
    %27 = vector.load %arg7[%c0_15, %c0_16, %c0_17, %c0_18] : memref<1x4x8x8xbf16, #tpu.memory_space<vmem>>, vector<1x4x8x8xbf16>
    %28 = vector.shape_cast %27 : vector<1x4x8x8xbf16> to vector<4x8x8xbf16>
    %29 = vector.shape_cast %26 : vector<4x8x8xbf16> to vector<1x4x8x8xbf16>
    tpu.vector_store %arg7[%c0_15, %c0_16, %c0_17, %c0_18], %29 {strides = array<i32>} : memref<1x4x8x8xbf16, #tpu.memory_space<vmem>>, vector<1x4x8x8xbf16>,
    return
  }
  func.func @transform_0(%arg0: i32, %arg1: i32) -> (i32, i32, i32) {
    %c0_i32 = arith.constant 0 : i32
    %c0_i32_0 = arith.constant 0 : i32
    return %arg0, %arg1, %c0_i32 : i32, i32, i32
  }
  func.func @transform_1(%arg0: i32, %arg1: i32) -> (i32, i32) {
    %c0_i32 = arith.constant 0 : i32
    %c0_i32_0 = arith.constant 0 : i32
    %c0_i32_1 = arith.constant 0 : i32
    return %c0_i32, %c0_i32_0 : i32, i32
  }
  func.func @transform_2(%arg0: i32, %arg1: i32) -> (i32, i32) {
    %c0_i32 = arith.constant 0 : i32
    %c0_i32_0 = arith.constant 0 : i32
    %c0_i32_1 = arith.constant 0 : i32
    return %c0_i32, %c0_i32_0 : i32, i32
  }
  func.func @transform_3(%arg0: i32, %arg1: i32) -> (i32, i32, i32, i32) {
    %c0_i32 = arith.constant 0 : i32
    %c0_i32_0 = arith.constant 0 : i32
    %c0_i32_1 = arith.constant 0 : i32
    return %arg0, %c0_i32, %arg1, %c0_i32_0 : i32, i32, i32, i32
  }
  func.func @transform_4(%arg0: i32, %arg1: i32) -> (i32, i32, i32, i32) {
    %c0_i32 = arith.constant 0 : i32
    %c0_i32_0 = arith.constant 0 : i32
    %c0_i32_1 = arith.constant 0 : i32
    return %arg0, %c0_i32, %arg1, %c0_i32_0 : i32, i32, i32, i32
  }
  func.func @transform_5(%arg0: i32, %arg1: i32) -> (i32, i32, i32, i32) {
    %c0_i32 = arith.constant 0 : i32
    %c0_i32_0 = arith.constant 0 : i32
    %c0_i32_1 = arith.constant 0 : i32
    return %arg0, %c0_i32, %arg1, %c0_i32_0 : i32, i32, i32, i32
  }
}

</mosaic_0001>

<bundles_post_ra>
// kernel: tpu_custom_call.1
= control target key start
LH: loop header
LB: loop body
LE: loop exit
PB: predicated region body
PF: predicated region fallthrough
CT: control target
= control target key end

     0   :  { %11 = vsyncpa [#allocation3], 0  ;;  %s1928_s0 = inlined_call_operand.hbm [shape: bf16[2,8,32], index: 0, kind: input, shape index: {}]   ;;  %s1929_s1 = inlined_call_operand.hbm [shape: bf16[32,96], index: 1, kind: input, shape index: {}]   ;;  %s1930_s2 = inlined_call_operand.hbm [shape: f32[1,96], index: 2, kind: input, shape index: {}]   ;;  %s1931_s3 = inlined_call_operand.hbm [shape: bf16[2,4,8,8], index: 3, kind: output, shape index: {0}]   ;;  %s1932_s4 = inlined_call_operand.hbm [shape: bf16[2,4,8,8], index: 4, kind: output, shape index: {1}]   ;;  %s1933_s5 = inlined_call_operand.hbm [shape: bf16[2,4,8,8], index: 5, kind: output, shape index: {2}]  }
   0x1   :  { %13 = vsyncpa [#allocation3 + $0x1], 0 }
   0x2   :  { %14 = vsyncpa [#allocation6], 0 }
   0x3   :  { %15 = vsyncpa [#allocation4], 0 }
   0x4   :  { %17 = vsyncpa [#allocation4 + $0x1], 0 }
   0x5   :  { %18 = vsyncpa [#allocation10], 0 }
   0x6   :  { %20 = vsyncpa [#allocation10 + $0x1], 0  ;;  %s1516_s18 = smov 0   ;;  %s1518_s19 = smov 0  }
   0x7   :  { %s1520_s20 = smov 0   ;;  %s1522_s21 = smov 0  }
   0x8   :  { %s1524_s22 = smov 0   ;;  %s1526_s23 = smov 0  }
   0x9 LB: > { %s1547_s24 = sadd.s32 4294967295, %s1466_s23   ;;  %s1937_s25 = sadd.s32 4294967294, %s1466_s23   ;;  %s1466_s23 = sphi %s1526_s23, %s26_s23   ;;  %s1462_s22 = sphi %s1524_s22, %s1956_s22   ;;  %s1458_s21 = sphi %s1522_s21, %s1955_s21   ;;  %s1454_s20 = sphi %s1520_s20, %s1954_s20   ;;  %s1450_s19 = sphi %s1518_s19, %s1953_s19   ;;  %s1446_s18 = sphi %s1516_s18, %s1952_s18  }
   0xa   : > { %p60_p0 = scmp.ne.s32.totalorder %s1450_s19, %s1446_s18  ;;  %p1934_p1 = scmp.eq.s32.totalorder %s1547_s24, 0 }
   0xb   : > { %p134_p3 = scmp.eq.s32.totalorder %s1937_s25, 1  ;;  %p1079_p5 = scmp.ge.s32.totalorder %s1466_s23, 1 }
   0xc   : > { %p1558_p4 = por %p1934_p1, %p60_p0  ;;  %p197_p7 = scmp.lt.s32.totalorder %s1466_s23, 3 }
   0xd   : > { %p1563_p6 = por %p134_p3, %p60_p0  ;;  %s1468_s29 = smov [#allocation5]  }
   0xe   : > { %s1938_s26 = scalar_select %p1558_p4, 1, 0 }
   0xf   : > { %s1939_s27 = scalar_select %p1563_p6, 1, 0 }
  0x10   : > { %p1568_p8 = pnand %p1079_p5, %p197_p7  ;;  %s209_s30 = sshll.u32 %s1468_s29, 4  ;;  %s1572_s30 = int_to_ptr.vmem [resolvable:$true] %s209_s30 }
  0x11   : > { %s1469_s7 = smov [#allocation7]   ;;  %s1234_s11 = scalar_lea.hbm %s1929_s1, 256 }
  0x12   : > { %p1143_p9 = pneg %p1568_p8  ;;  %s223_s8 = sshll.u32 %s1469_s7, 4  ;;  %s1583_s8 = int_to_ptr.vmem [resolvable:$true] %s223_s8 }
  0x13   : > { %p1235_p12 = scmp.ne.s32.totalorder %s1929_s1, %s1234_s11  ;;  %p1241_p5 = scmp.lt.u32.totalorder %s1234_s11, %s1929_s1 }
  0x14   : > { %p1579_p11 = pnand %p1143_p9, %p1934_p1 }
  0x16   : > { %p1236_p13 = pneg %p1579_p11 }
  0x18   : > { %p1237_p0 = pnand %p1236_p13, %p1235_p12 }
  0x1a   : > { %p1238_p3 = pneg %p1237_p0 }
  0x1c   : > { %p1243_p7 = pnand %p1241_p5, %p1238_p3 }
  0x1e   : > { %1246 = shalt.err (!%p1243_p7)
}
  0x1f   : > { %s1247_s16 = scalar_lea.vmem %s1572_s30, 256  ;;  %p1255_p2 = scmp.lt.s32.totalorder %s1572_s30, %s1572_s30 }
  0x20   : > { %p1248_p9 = scmp.ne.s32.totalorder %s1572_s30, %s1247_s16  ;;  %p1256_p12 = scmp.lt.s32.totalorder %s1247_s16, %s1247_s16 }
  0x22   : > { %p1250_p10 = pnand %p1248_p9, %p1236_p13  ;;  %p1257_p0 = por %p1256_p12, %p1255_p2 }
  0x24   : > { %p1251_p1 = pneg %p1250_p10 }
  0x26   : > { %p1258_p6 = pnand %p1257_p0, %p1251_p1 }
  0x28   : > { %1261 = shalt.err (!%p1258_p6)
}
  0x29   : > { %s1470_s17 = smov 64   ;;  %s1471_s29 = smov 4  }
  0x2a   : > { %1146 = dma.hbm_to_vmem [thread:$0]  (!%p1579_p11), %s1929_s1, 256, %s1572_s30, [#allocation6], %s1470_s17, %s1470_s17, %s1471_s29  }
  0x2b   : > { %s1262_s12 = scalar_lea.hbm %s1930_s2, 16 }
  0x2c   : > { %p1263_p2 = scmp.ne.s32.totalorder %s1930_s2, %s1262_s12  ;;  %p1269_p10 = scmp.lt.u32.totalorder %s1262_s12, %s1930_s2 }
  0x2e   : > { %p1265_p1 = pnand %p1263_p2, %p1236_p13 }
  0x30   : > { %p1266_p6 = pneg %p1265_p1 }
  0x32   : > { %p1271_p3 = pnand %p1269_p10, %p1266_p6 }
  0x34   : > { %1274 = shalt.err (!%p1271_p3)
}
  0x35   : > { %s1275_s30 = scalar_lea.vmem %s1583_s8, 16  ;;  %s1282_s17 = scalar_lea.vmem %s1583_s8, 32 }
  0x36   : > { %p1276_p5 = scmp.ne.s32.totalorder %s1583_s8, %s1275_s30  ;;  %p1283_p12 = scmp.lt.s32.totalorder %s1583_s8, %s1583_s8 }
  0x37   : > { %p1284_p0 = scmp.lt.s32.totalorder %s1282_s17, %s1275_s30 }
  0x38   : > { %p1278_p7 = pnand %p1276_p5, %p1236_p13 }
  0x39   : > { %p1285_p2 = por %p1284_p0, %p1283_p12 }
  0x3a   : > { %p1279_p9 = pneg %p1278_p7 }
  0x3c   : > { %p1286_p1 = pnand %p1285_p2, %p1279_p9 }
  0x3e   : > { %1289 = shalt.err (!%p1286_p1)
}
  0x3f   : > { %1149 = dma.hbm_to_vmem [thread:$0]  (!%p1579_p11), %s1930_s2, 16, %s1583_s8, [#allocation6]  }
  0x40   : > { %s38_s9 = sadd.s32 1, %s1462_s22  ;;  %s47_s10 = sadd.s32 1, %s1454_s20 }
  0x41   : > { %p40_p13 = scmp.ge.s32.totalorder %s38_s9, 2  ;;  %p54_p6 = scmp.ne.s32.totalorder %s1454_s20, %s1450_s19 }
  0x42   : > { %p55_p10 = scmp.eq.s32.totalorder %s1466_s23, 0  ;;  %p1166_p3 = scmp.lt.s32.totalorder %s1466_s23, 2 }
  0x43   : > { %s1958_s9 = smov (%p40_p13, %s38_s9), 0  ;;  %p1942_p7 = scmp.eq.s32.totalorder %s1547_s24, 1 }
  0x44   : > { %p56_p5 = por %p55_p10, %p54_p6  ;;  %s42_s11 = ssub.s32 %s1462_s22, %s1958_s9 }
  0x45   : > { %p1648_p9 = por %p1942_p7, %p54_p6  ;;  %s234_s12 = sand.u32 1, %s1454_s20  }
  0x46   : > { %p45_p12 = scmp.eq.s32.totalorder %s42_s11, 0  ;;  %s1083_s8 = sshll.u32 %s234_s12, 2 }
  0x47   : > { %s1943_s6 = scalar_select %p1648_p9, 1, 0 }
  0x48   : > { %s1084_s13 = sshll.u32 %s1462_s22, 6  ;;  %s238_s17 = scalar_lea.vmem [#allocation2], %s1083_s8 }
  0x49   : > { %s1657_s14 = scalar_select %p45_p12, %s1454_s20, %s47_s10  }
  0x4a   : > { %s1662_s30 = scalar_lea.hbm %s1928_s0, %s1084_s13  ;;  %s246_s29 = sshll.u32 %s238_s17, 4  ;;  %s1670_s29 = int_to_ptr.vmem [resolvable:$true] %s246_s29 }
  0x4b   : > { %p1666_p11 = pnand %p1166_p3, %p56_p5  ;;  %s235_s10 = scalar_lea.sflag [#allocation3], %s234_s12 }
  0x4c   : > { %s1290_s11 = scalar_lea.hbm %s1662_s30, 64  ;;  %s1295_s15 = scalar_lea.hbm %s1928_s0, 128 }
  0x4d   : > { %p1291_p0 = scmp.ne.s32.totalorder %s1662_s30, %s1290_s11  ;;  %p1292_p2 = pneg %p1666_p11 }
  0x4e   : > { %p1296_p6 = scmp.lt.u32.totalorder %s1662_s30, %s1928_s0  ;;  %p1297_p10 = scmp.lt.u32.totalorder %s1295_s15, %s1290_s11 }
  0x4f   : > { %p1293_p1 = pnand %p1292_p2, %p1291_p0  ;;  %p1299_p5 = scmp.lt.u32.totalorder %s1290_s11, %s1662_s30 }
  0x50   : > { %p1298_p3 = por %p1297_p10, %p1296_p6 }
  0x51   : > { %p1294_p13 = pneg %p1293_p1 }
  0x52   : > { %p1300_p7 = por %p1299_p5, %p1298_p3 }
  0x54   : > { %p1301_p12 = pnand %p1300_p7, %p1294_p13 }
  0x56   : > { %1304 = shalt.err (!%p1301_p12)
}
  0x57   : > { %s1305_s12 = scalar_lea.vmem %s1670_s29, 64  ;;  %s1472_s8 = smov [#allocation2]  }
  0x58   : > { %p1306_p0 = scmp.ne.s32.totalorder %s1670_s29, %s1305_s12  ;;  %s1310_s13 = sshll.u32 %s1472_s8, 4  ;;  %s1311_s13 = int_to_ptr.vmem [resolvable:$false] %s1310_s13 }
  0x59   : > { %s1312_s16 = scalar_lea.vmem %s1311_s13, 128  ;;  %p1313_p4 = scmp.lt.s32.totalorder %s1670_s29, %s1311_s13 }
  0x5a   : > { %p1308_p1 = pnand %p1306_p0, %p1292_p2  ;;  %p1314_p6 = scmp.lt.s32.totalorder %s1312_s16, %s1305_s12 }
  0x5c   : > { %p1309_p9 = pneg %p1308_p1  ;;  %p1315_p10 = por %p1314_p6, %p1313_p4 }
  0x5e   : > { %p1316_p3 = pnand %p1315_p10, %p1309_p9 }
  0x60   : > { %1319 = shalt.err (!%p1316_p3)
}
  0x61   : > { %1153 = dma.hbm_to_vmem [thread:$0]  (!%p1666_p11), %s1662_s30, 64, %s1670_s29, %s235_s10  }
  0x62   : > { %255 = sbr.rel (%p1568_p8) target bundleno = 626 (0x272), region = 32  ;;  %s1700_s11 = sand.u32 (!%p1568_p8), 1, %s1450_s19  }
  0x63   : > { %s1086_s15 = sshll.u32 (!%p1568_p8), %s1700_s11, 2  ;;  %s258_s17 = scalar_lea.sflag (!%p1568_p8), [#allocation3], %s1700_s11 }
  0x64   : > { %s261_s12 = scalar_lea.vmem (!%p1568_p8), [#allocation2], %s1086_s15  ;;  %p1945_p4 = scmp.ne.s32.totalorder (!%p1568_p8), %s1938_s26, 0 }
  0x69   : > { %1429 = dma.done.wait (%p1945_p4), %s258_s17, 64  }
  0x6a   : > { %1431 = vsyncadd (%p1945_p4), %s258_s17, 4294967232  ;;  %p1946_p9 = scmp.eq.s32.totalorder %s1547_s24, 0 }
  0x6c   : > { %1433 = dma.done.wait (%p1946_p9), [#allocation6], 272   ;;  %p1947_p11 = pmov %p1946_p9 }
  0x6d   : > { %v1473_v0 = vmov 0.0   ;;  %vm1474_vm0 = vmmov 0   ;;  %v1232_v1 = vld [vmem:[#allocation5] sm:$0xff]   ;;  %v1233_v2 = vld [vmem:[#allocation5 + $0x8] sm:$0xff]   ;;  %v307_v3 = vld [vmem:[%s261_s12] sm:$0xf]  ;;  %v391_v15 = vlaneseq }
  0x6e   : > { %1435 = vsyncadd (%p1947_p11), [#allocation6], 4294967024  ;;  %1119 = vmatprep.subr.bf16.mxu0 %v1473_v0  ;;  %1123 = vmatprep.mubr.msk.bf16.mxu0 %vm1474_vm0, %v1473_v0  ;;  %vm331_vm1 = vcmask 261120   ;;  %v1092_v4 = vld [vmem:[#allocation7] ss:$0 sm:$0xff]  ;;  %s1475_s26 = smov 104  }
  0x6f   : > { %1120 = vmatpush3.bf16.msra.mxu0 %v1232_v1  ;;  %s1476_s28 = smov 120   ;;  %s1477_s30 = smov 96   ;;  %v1480_v13 = vmov 1983009808   ;;  %v1481_v18 = vmov 1934713408  }
  0x70   : > { %1121 = vmatprep.subr.bf16.mxu0 %v1473_v0  ;;  %s1478_s29 = smov 112   ;;  %s1479_s7 = smov 64   ;;  %v389_v14 = vunpack.c.l.s4 %v1480_v13  ;;  %v421_v19 = vunpack.c.l.s4 %v1481_v18  ;;  %v392_v21 = vshrl.u32 %v391_v15, 7  ;;  %vm526_vm2 = vcmask 60416  }
  0x71   : > { %s1737_s10 = sshll.u32 %s1700_s11, 4  ;;  %s1744_s8 = sshll.u32 %s1458_s21, 8 }
  0x72   : > { %v390_v20 = vunpack.c.0.s8 %v389_v14  ;;  %v422_v24 = vunpack.c.0.s8 %v421_v19  ;;  %s291_s13 = scalar_lea.vmem [#allocation8], %s1737_s10  ;;  %s1751_s12 = scalar_lea.hbm %s1931_s3, %s1744_s8 }
  0x73   : > { %1122 = vmatpush3.bf16.msra.mxu0 %v1233_v2  ;;  %s875_s16 = sshll.u32 %s291_s13, 4  ;;  %s851_s21 = scalar_lea.sflag [#allocation4], %s1700_s11  ;;  %s1753_s16 = int_to_ptr.vmem [resolvable:$true] %s875_s16 }
  0x74   : > { %v1719_v25 = vsub.s32 %v390_v20, %v392_v21  ;;  %v1722_v32 = vsub.s32 %v422_v24, %v392_v21  ;;  %p1948_p2 = scmp.ne.s32.totalorder %s1943_s6, 0 }
  0x76   : > { %1124 = vmatmul.mubr.msk.bf16.vlgmr.msra.gmra.mrb[0].mxu0 %vm331_vm1, %v307_v3 }
 0x149   : > { %v369_v5 = vpop.f32.mrb[0].mxu0 }
 0x14a   : > { %v370_v6 = vadd.f32 %v1092_v4, %v369_v5  ;;  %v1125_v7 = vpop.f32.mrb[1].mxu0 }
 0x14b   : > { %v372_v8 = vpop.f32.mrb[2].mxu0 }
 0x14c   : > { %536 = vrot.lane.b32.xlu1 %v370_v6, %s1475_s26  ;;  %532 = vrot.lane.b32.xlu0 %v370_v6, %s1476_s28  ;;  %v1126_v9 = vpop.f32.mrb[3].mxu0  ;;  %v375_v10 = vmul.f32 0.35355338, %v370_v6 }
 0x150   : > { %538 = vrot.lane.b32.xlu1 %v370_v6, %s1477_s30  ;;  %534 = vrot.lane.b32.xlu0 %v370_v6, %s1478_s29 }
 0x154   : > { %694 = vrot.lane.b32.xlu0 %v370_v6, %s1479_s7  ;;  %377 = vrot.lane.b32.xlu1 %v375_v10, %s1476_s28  ;;  %s1482_s28 = smov [#allocation8]  }
 0x158   : > { %380 = vrot.lane.b32.xlu0 %v375_v10, %s1478_s29  ;;  %383 = vrot.lane.b32.xlu1 %v375_v10, %s1475_s26  ;;  %s1320_s26 = scalar_lea.vmem %s1753_s16, 256 }
 0x159   : > { %p1321_p8 = scmp.ne.s32.totalorder %s1753_s16, %s1320_s26 }
 0x15b   : > { %p1322_p13 = pnand %p1321_p8, %p1948_p2 }
 0x15d   : > { %p1323_p5 = pneg %p1322_p13 }
 0x1be   : > { %v537_v11 = vpop.permute.xlu1 %536  ;;  %v533_v12 = vpop.permute.xlu0 %532 }
 0x1bf   : > { %540 = vrot.lane.b32.xlu0 %v533_v12, %s1477_s30 }
 0x1c2   : > { %v1713_v16 = vpop.permute.xlu1 %538  ;;  %v535_v17 = vpop.permute.xlu0 %534 }
 0x1c3   : > { %544 = vrot.lane.b32.xlu0 %v537_v11, %s1477_s30  ;;  %542 = vrot.lane.b32.xlu1 %v535_v17, %s1477_s30  ;;  %s1324_s30 = sshll.u32 %s1482_s28, 4  ;;  %s1325_s30 = int_to_ptr.vmem [resolvable:$false] %s1324_s30 }
 0x1c4   : > { %s1326_s29 = scalar_lea.vmem %s1325_s30, 512  ;;  %p1327_p7 = scmp.lt.s32.totalorder %s1753_s16, %s1325_s30 }
 0x1c5   : > { %p1328_p12 = scmp.lt.s32.totalorder %s1326_s29, %s1320_s26 }
 0x1c6   : > { %v1715_v22 = vpop.permute.xlu0 %694  ;;  %v378_v23 = vpop.permute.xlu1 %377 }
 0x1c7   : > { %698 = vrot.lane.b32.xlu0 %v535_v17, %s1479_s7  ;;  %696 = vrot.lane.b32.xlu1 %v533_v12, %s1479_s7  ;;  %p1329_p0 = por %p1328_p12, %p1327_p7 }
 0x1c9   : > { %p1330_p1 = pnand %p1329_p0, %p1323_p5 }
 0x1ca   : > { %v381_v26 = vpop.permute.xlu0 %380  ;;  %v384_v27 = vpop.permute.xlu1 %383 }
 0x1cb   : > { %v386_v28 = vcombine.low %v375_v10, %v381_v26  ;;  %v387_v29 = vcombine.high %v375_v10, %v381_v26  ;;  %v402_v30 = vcombine.low %v378_v23, %v384_v27  ;;  %v403_v31 = vcombine.high %v378_v23, %v384_v27  ;;  %700 = vrot.lane.b32.xlu1 %v537_v11, %s1479_s7 }
 0x1cd   : > { %v394_v33 = vrot.slane %v386_v28, %v1719_v25  ;;  %v401_v34 = vrot.slane %v387_v29, %v1719_v25  ;;  %v410_v35 = vrot.slane %v402_v30, %v1719_v25  ;;  %v417_v36 = vrot.slane %v403_v31, %v1719_v25 }
 0x1cf   : > { %v418_v37 = vcombine.low %v394_v33, %v410_v35  ;;  %v419_v38 = vcombine.high %v394_v33, %v410_v35  ;;  %v434_v39 = vcombine.low %v401_v34, %v417_v36  ;;  %v435_v40 = vcombine.high %v401_v34, %v417_v36 }
 0x1d1   : > { %v426_v41 = vrot.slane %v418_v37, %v1722_v32  ;;  %v433_v42 = vrot.slane %v419_v38, %v1722_v32  ;;  %v442_v43 = vrot.slane %v434_v39, %v1722_v32  ;;  %v449_v44 = vrot.slane %v435_v40, %v1722_v32 }
 0x1d3   : > { %v454_v45 = vcombine.low %v426_v41, %v433_v42  ;;  %v1096_v46 = vcombine.high %v426_v41, %v433_v42  ;;  %v470_v47 = vcombine.low %v442_v43, %v449_v44  ;;  %v1097_v48 = vcombine.high %v442_v43, %v449_v44 }
 0x1d5   : > { %v461_v49 = vrot.slane %v454_v45, %v1719_v25  ;;  %v469_v50 = vrot.slane %v1096_v46, %v1719_v25  ;;  %v477_v51 = vrot.slane %v470_v47, %v1719_v25  ;;  %v485_v52 = vrot.slane %v1097_v48, %v1719_v25 }
 0x1d7   : > { %v486_v53 = vcombine.low %v461_v49, %v469_v50  ;;  %v487_v54 = vcombine.high %v461_v49, %v469_v50  ;;  %v502_v55 = vcombine.low %v477_v51, %v485_v52  ;;  %v503_v56 = vcombine.high %v477_v51, %v485_v52 }
 0x1d9   : > { %v494_v57 = vrot.slane %v486_v53, %v1722_v32  ;;  %v501_v58 = vrot.slane %v487_v54, %v1722_v32  ;;  %v510_v59 = vrot.slane %v502_v55, %v1722_v32  ;;  %v517_v60 = vrot.slane %v503_v56, %v1722_v32 }
 0x1db   : > { %v518_v61 = vcombine.low %v494_v57, %v510_v59  ;;  %v519_v62 = vcombine.high %v494_v57, %v510_v59  ;;  %v520_v63 = vcombine.low %v501_v58, %v517_v60  ;;  %v521_v0 = vcombine.high %v501_v58, %v517_v60 }
 0x1dd   : > { %v522_v1 = vpack.c.bf16 %v518_v61, %v518_v61  ;;  %v523_v2 = vpack.c.bf16 %v519_v62, %v519_v62  ;;  %v524_v3 = vpack.c.bf16 %v520_v63, %v520_v63  ;;  %v525_v4 = vpack.c.bf16 %v521_v0, %v521_v0 }
 0x1df   : > { %527 = vst.msk [vmem:[%s291_s13] sm:$0xf] %vm526_vm2, %v522_v1  ;;  %528 = vst.msk [vmem:[%s291_s13 + $0x4] sm:$0xf] %vm526_vm2, %v523_v2 }
 0x1e0   : > { %529 = vst.msk [vmem:[%s291_s13 + $0x8] sm:$0xf] %vm526_vm2, %v524_v3  ;;  %530 = vst.msk [vmem:[%s291_s13 + $0xc] sm:$0xf] %vm526_vm2, %v525_v4 }
 0x1e1   : > { %1333 = shalt.err (!%p1330_p1)
}
 0x1e2   : > { %s1334_s13 = scalar_lea.hbm %s1751_s12, 256  ;;  %s1338_s28 = scalar_lea.hbm %s1931_s3, 512 }
 0x1e3   : > { %p1335_p6 = scmp.ne.s32.totalorder %s1751_s12, %s1334_s13  ;;  %p1339_p4 = scmp.lt.u32.totalorder %s1751_s12, %s1931_s3 }
 0x1e4   : > { %p1340_p9 = scmp.lt.u32.totalorder %s1338_s28, %s1334_s13  ;;  %p1342_p8 = scmp.lt.u32.totalorder %s1334_s13, %s1751_s12 }
 0x1e5   : > { %p1336_p10 = pnand %p1335_p6, %p1948_p2 }
 0x1e6   : > { %p1341_p11 = por %p1340_p9, %p1339_p4 }
 0x1e7   : > { %p1337_p3 = pneg %p1336_p10 }
 0x1e8   : > { %p1343_p13 = por %p1342_p8, %p1341_p11 }
 0x1ea   : > { %p1344_p5 = pnand %p1343_p13, %p1337_p3 }
 0x1ec   : > { %1347 = shalt.err (!%p1344_p5)
}
 0x1ed   : > { %s1483_s26 = smov 4   ;;  %s855_s25 = sand.u32 1, %s1547_s24  }
 0x1ee   : > { %1137 = dma.vmem_to_hbm [thread:$0]  (%p1948_p2), %s1753_s16, 256, %s1751_s12, %s851_s21, %s1479_s7, %s1479_s7, %s1483_s26  }
 0x1ef   : > { %s298_s11 = scalar_lea.vmem [#allocation9], %s1737_s10  ;;  %s1820_s29 = scalar_lea.hbm %s1932_s4, %s1744_s8 }
 0x1f0   : > { %s892_s16 = sshll.u32 %s298_s11, 4  ;;  %s1834_s13 = scalar_lea.sflag [#allocation10], %s855_s25  ;;  %s1822_s16 = int_to_ptr.vmem [resolvable:$true] %s892_s16 }
 0x1f1   : > { %s1348_s15 = scalar_lea.vmem %s1822_s16, 256  ;;  %s1484_s17 = smov [#allocation9]  }
 0x1f2   : > { %p1349_p7 = scmp.ne.s32.totalorder %s1822_s16, %s1348_s15  ;;  %s1352_s28 = sshll.u32 %s1484_s17, 4  ;;  %s1353_s28 = int_to_ptr.vmem [resolvable:$false] %s1352_s28 }
 0x1f3   : > { %s1354_s30 = scalar_lea.vmem %s1353_s28, 512  ;;  %p1355_p1 = scmp.lt.s32.totalorder %s1822_s16, %s1353_s28 }
 0x1f4   : > { %p1350_p12 = pnand %p1349_p7, %p1948_p2  ;;  %p1356_p6 = scmp.lt.s32.totalorder %s1354_s30, %s1348_s15 }
 0x1f6   : > { %p1351_p0 = pneg %p1350_p12  ;;  %p1357_p10 = por %p1356_p6, %p1355_p1 }
 0x1f8   : > { %p1358_p3 = pnand %p1357_p10, %p1351_p0 }
 0x231   : > { %v541_v5 = vpop.permute.xlu0 %540 }
 0x235   : > { %v545_v6 = vpop.permute.xlu0 %544  ;;  %v543_v7 = vpop.permute.xlu1 %542 }
 0x236   : > { %v566_v8 = vcombine.low %v541_v5, %v545_v6  ;;  %v567_v9 = vcombine.high %v541_v5, %v545_v6  ;;  %v550_v10 = vcombine.low %v1713_v16, %v543_v7  ;;  %v551_v11 = vcombine.high %v1713_v16, %v543_v7 }
 0x238   : > { %v574_v12 = vrot.slane %v566_v8, %v1719_v25  ;;  %v581_v13 = vrot.slane %v567_v9, %v1719_v25  ;;  %v558_v14 = vrot.slane %v550_v10, %v1719_v25  ;;  %v565_v15 = vrot.slane %v551_v11, %v1719_v25 }
 0x239   : > { %v697_v17 = vpop.permute.xlu1 %696  ;;  %v699_v23 = vpop.permute.xlu0 %698 }
 0x23a   : > { %v582_v18 = vcombine.low %v558_v14, %v574_v12  ;;  %v583_v19 = vcombine.high %v558_v14, %v574_v12  ;;  %v598_v20 = vcombine.low %v565_v15, %v581_v13  ;;  %v599_v21 = vcombine.high %v565_v15, %v581_v13 }
 0x23b   : > { %v706_v28 = vcombine.low %v1715_v22, %v699_v23  ;;  %v707_v29 = vcombine.high %v1715_v22, %v699_v23 }
 0x23c   : > { %v590_v24 = vrot.slane %v582_v18, %v1722_v32  ;;  %v597_v26 = vrot.slane %v583_v19, %v1722_v32  ;;  %v606_v16 = vrot.slane %v598_v20, %v1722_v32  ;;  %v613_v27 = vrot.slane %v599_v21, %v1722_v32 }
 0x23d   : > { %v701_v30 = vpop.permute.xlu1 %700  ;;  %v714_v42 = vrot.slane %v706_v28, %v1719_v25  ;;  %v721_v22 = vrot.slane %v707_v29, %v1719_v25 }
 0x23e   : > { %v618_v31 = vcombine.low %v590_v24, %v597_v26  ;;  %v1098_v33 = vcombine.high %v590_v24, %v597_v26  ;;  %v634_v34 = vcombine.low %v606_v16, %v613_v27  ;;  %v1099_v35 = vcombine.high %v606_v16, %v613_v27 }
 0x23f   : > { %v722_v36 = vcombine.low %v697_v17, %v701_v30  ;;  %v723_v37 = vcombine.high %v697_v17, %v701_v30 }
 0x240   : > { %v625_v38 = vrot.slane %v618_v31, %v1719_v25  ;;  %v633_v39 = vrot.slane %v1098_v33, %v1719_v25  ;;  %v641_v40 = vrot.slane %v634_v34, %v1719_v25  ;;  %v649_v41 = vrot.slane %v1099_v35, %v1719_v25 }
 0x241   : > { %v730_v43 = vrot.slane %v722_v36, %v1719_v25  ;;  %v737_v44 = vrot.slane %v723_v37, %v1719_v25 }
 0x242   : > { %v650_v45 = vcombine.low %v625_v38, %v633_v39  ;;  %v651_v46 = vcombine.high %v625_v38, %v633_v39  ;;  %v666_v47 = vcombine.low %v641_v40, %v649_v41  ;;  %v667_v48 = vcombine.high %v641_v40, %v649_v41 }
 0x243   : > { %v738_v49 = vcombine.low %v714_v42, %v730_v43  ;;  %v739_v50 = vcombine.high %v714_v42, %v730_v43  ;;  %v754_v51 = vcombine.low %v721_v22, %v737_v44  ;;  %v755_v52 = vcombine.high %v721_v22, %v737_v44 }
 0x244   : > { %v658_v53 = vrot.slane %v650_v45, %v1722_v32  ;;  %v665_v54 = vrot.slane %v651_v46, %v1722_v32  ;;  %v674_v55 = vrot.slane %v666_v47, %v1722_v32  ;;  %v681_v56 = vrot.slane %v667_v48, %v1722_v32 }
 0x245   : > { %v746_v57 = vrot.slane %v738_v49, %v1722_v32  ;;  %v753_v58 = vrot.slane %v739_v50, %v1722_v32  ;;  %v762_v59 = vrot.slane %v754_v51, %v1722_v32  ;;  %v769_v60 = vrot.slane %v755_v52, %v1722_v32 }
 0x246   : > { %v682_v61 = vcombine.low %v658_v53, %v674_v55  ;;  %v683_v62 = vcombine.high %v658_v53, %v674_v55  ;;  %v684_v63 = vcombine.low %v665_v54, %v681_v56  ;;  %v685_v0 = vcombine.high %v665_v54, %v681_v56 }
 0x247   : > { %v774_v1 = vcombine.low %v746_v57, %v753_v58  ;;  %v1100_v2 = vcombine.high %v746_v57, %v753_v58  ;;  %v790_v3 = vcombine.low %v762_v59, %v769_v60  ;;  %v1101_v4 = vcombine.high %v762_v59, %v769_v60 }
 0x248   : > { %v686_v5 = vpack.c.bf16 %v682_v61, %v682_v61  ;;  %v687_v6 = vpack.c.bf16 %v683_v62, %v683_v62  ;;  %v688_v7 = vpack.c.bf16 %v684_v63, %v684_v63  ;;  %v689_v8 = vpack.c.bf16 %v685_v0, %v685_v0 }
 0x249   : > { %v781_v9 = vrot.slane %v774_v1, %v1719_v25  ;;  %v789_v10 = vrot.slane %v1100_v2, %v1719_v25  ;;  %v797_v11 = vrot.slane %v790_v3, %v1719_v25  ;;  %v805_v12 = vrot.slane %v1101_v4, %v1719_v25 }
 0x24a   : > { %690 = vst.msk [vmem:[%s298_s11] sm:$0xf] %vm526_vm2, %v686_v5  ;;  %691 = vst.msk [vmem:[%s298_s11 + $0x4] sm:$0xf] %vm526_vm2, %v687_v6 }
 0x24b   : > { %692 = vst.msk [vmem:[%s298_s11 + $0x8] sm:$0xf] %vm526_vm2, %v688_v7  ;;  %693 = vst.msk [vmem:[%s298_s11 + $0xc] sm:$0xf] %vm526_vm2, %v689_v8  ;;  %v806_v13 = vcombine.low %v781_v9, %v789_v10  ;;  %v807_v14 = vcombine.high %v781_v9, %v789_v10  ;;  %v822_v15 = vcombine.low %v797_v11, %v805_v12 }
 0x24c   : > { %v823_v17 = vcombine.high %v797_v11, %v805_v12 }
 0x24d   : > { %1361 = shalt.err (!%p1358_p3)
}
 0x24e   : > { %s1362_s24 = scalar_lea.hbm %s1820_s29, 256  ;;  %s1366_s12 = scalar_lea.hbm %s1932_s4, 512 }
 0x24f   : > { %p1363_p4 = scmp.ne.s32.totalorder %s1820_s29, %s1362_s24  ;;  %p1367_p8 = scmp.lt.u32.totalorder %s1820_s29, %s1932_s4 }
 0x250   : > { %p1368_p13 = scmp.lt.u32.totalorder %s1366_s12, %s1362_s24  ;;  %p1370_p7 = scmp.lt.u32.totalorder %s1362_s24, %s1820_s29 }
 0x251   : > { %p1364_p9 = pnand %p1363_p4, %p1948_p2 }
 0x252   : > { %p1369_p5 = por %p1368_p13, %p1367_p8 }
 0x253   : > { %p1365_p11 = pneg %p1364_p9 }
 0x254   : > { %p1371_p12 = por %p1370_p7, %p1369_p5 }
 0x256   : > { %p1372_p0 = pnand %p1371_p12, %p1365_p11 }
 0x258   : > { %1375 = shalt.err (!%p1372_p0)
}
 0x259   : > { %1138 = dma.vmem_to_hbm [thread:$0]  (%p1948_p2), %s1822_s16, 256, %s1820_s29, %s1834_s13, %s1479_s7, %s1479_s7, %s1483_s26   ;;  %v814_v25 = vrot.slane %v806_v13, %v1722_v32  ;;  %v821_v18 = vrot.slane %v807_v14, %v1722_v32  ;;  %v830_v19 = vrot.slane %v822_v15, %v1722_v32  ;;  %v837_v20 = vrot.slane %v823_v17, %v1722_v32 }
 0x25a   : > { %s305_s15 = scalar_lea.vmem [#allocation11], %s1737_s10  ;;  %s1870_s30 = scalar_lea.hbm %s1933_s5, %s1744_s8 }
 0x25b   : > { %s909_s28 = sshll.u32 %s305_s15, 4  ;;  %v838_v21 = vcombine.low %v814_v25, %v830_v19  ;;  %v839_v23 = vcombine.high %v814_v25, %v830_v19  ;;  %v840_v24 = vcombine.low %v821_v18, %v837_v20  ;;  %v841_v26 = vcombine.high %v821_v18, %v837_v20  ;;  %s1485_s8 = smov [#allocation11]   ;;  %s1872_s28 = int_to_ptr.vmem [resolvable:$true] %s909_s28 }
 0x25c   : > { %s1376_s10 = scalar_lea.vmem %s1872_s28, 256  ;;  %s1380_s24 = sshll.u32 %s1485_s8, 4  ;;  %s1381_s24 = int_to_ptr.vmem [resolvable:$false] %s1380_s24 }
 0x25d   : > { %v842_v16 = vpack.c.bf16 %v838_v21, %v838_v21  ;;  %v843_v27 = vpack.c.bf16 %v839_v23, %v839_v23  ;;  %v844_v28 = vpack.c.bf16 %v840_v24, %v840_v24  ;;  %v845_v29 = vpack.c.bf16 %v841_v26, %v841_v26  ;;  %p1377_p1 = scmp.ne.s32.totalorder %s1872_s28, %s1376_s10  ;;  %s1382_s25 = scalar_lea.vmem %s1381_s24, 512 }
 0x25e   : > { %p1383_p3 = scmp.lt.s32.totalorder %s1872_s28, %s1381_s24  ;;  %p1384_p4 = scmp.lt.s32.totalorder %s1382_s25, %s1376_s10 }
 0x25f   : > { %846 = vst.msk [vmem:[%s305_s15] sm:$0xf] %vm526_vm2, %v842_v16  ;;  %847 = vst.msk [vmem:[%s305_s15 + $0x4] sm:$0xf] %vm526_vm2, %v843_v27  ;;  %p1378_p6 = pnand %p1377_p1, %p1948_p2 }
 0x260   : > { %848 = vst.msk [vmem:[%s305_s15 + $0x8] sm:$0xf] %vm526_vm2, %v844_v28  ;;  %849 = vst.msk [vmem:[%s305_s15 + $0xc] sm:$0xf] %vm526_vm2, %v845_v29  ;;  %p1385_p9 = por %p1384_p4, %p1383_p3 }
 0x261   : > { %p1379_p10 = pneg %p1378_p6 }
 0x263   : > { %p1386_p11 = pnand %p1385_p9, %p1379_p10 }
 0x265   : > { %1389 = shalt.err (!%p1386_p11)
}
 0x266   : > { %s1390_s11 = scalar_lea.hbm %s1870_s30, 256  ;;  %s1394_s17 = scalar_lea.hbm %s1933_s5, 512 }
 0x267   : > { %p1391_p8 = scmp.ne.s32.totalorder %s1870_s30, %s1390_s11  ;;  %p1395_p7 = scmp.lt.u32.totalorder %s1870_s30, %s1933_s5 }
 0x268   : > { %p1396_p12 = scmp.lt.u32.totalorder %s1394_s17, %s1390_s11  ;;  %p1398_p1 = scmp.lt.u32.totalorder %s1390_s11, %s1870_s30 }
 0x269   : > { %p1392_p13 = pnand %p1391_p8, %p1948_p2 }
 0x26a   : > { %p1397_p0 = por %p1396_p12, %p1395_p7 }
 0x26b   : > { %p1393_p5 = pneg %p1392_p13 }
 0x26c   : > { %p1399_p6 = por %p1398_p1, %p1397_p0 }
 0x26e   : > { %p1400_p10 = pnand %p1399_p6, %p1393_p5 }
 0x270   : > { %1403 = shalt.err (!%p1400_p10)
}
 0x271   : > { %1139 = dma.vmem_to_hbm [thread:$0]  (%p1948_p2), %s1872_s28, 256, %s1870_s30, %s1834_s13, %s1479_s7, %s1479_s7, %s1483_s26  }
 0x272 PF: > { %s924_s29 = sand.u32 1, %s1446_s18   ;;  %p1949_p3 = scmp.ne.s32.totalorder %s1939_s27, 0 }
 0x273   : > { %p1950_p4 = scmp.ge.s32.totalorder %s1466_s23, 2  ;;  %s925_s10 = scalar_lea.sflag [#allocation4], %s924_s29 }
 0x275   : > { %p1155_p9 = pnand %p1950_p4, %p1949_p3 }
 0x277   : > { %1437 = dma.done.wait (!%p1155_p9), %s925_s10, 256  }
 0x278   : > { %1439 = vsyncadd (!%p1155_p9), %s925_s10, 4294967040  ;;  %s1951_s6 = sadd.s32 4294967294, %s1466_s23  }
 0x279   : > { %s933_s8 = sand.u32 1, %s1951_s6  }
 0x27a   : > { %s934_s24 = scalar_lea.sflag [#allocation10], %s933_s8 }
 0x27b   : > { %1441 = dma.done.wait (!%p1155_p9), %s934_s24, 512  }
 0x27c   : > { %1443 = vsyncadd (!%p1155_p9), %s934_s24, 4294966784  ;;  %s26_s23 = sadd.s32 1, %s1466_s23   ;;  %s1952_s18 = smov %s1450_s19 }
 0x27d   : > { %p23_p2 = scmp.ge.s32.totalorder %s26_s23, 4   ;;  %s1953_s19 = smov %s1454_s20 }
 0x27e   : > { %s1954_s20 = smov %s1657_s14  ;;  %s1955_s21 = smov %s1462_s22 }
 0x27f   : > { %s1956_s22 = smov %s1958_s9  ;;  %25 = sbr.rel (!%p23_p2) target bundleno = 9 (0x9), region = 117 }
 0x286   :  { %948 = vsyncpa [#allocation3], 1 }
 0x287   :  { %950 = vsyncpa [#allocation3 + $0x1], 1 }
 0x288   :  { %951 = vsyncpa [#allocation6], 1 }
 0x289   :  { %952 = vsyncpa [#allocation4], 1 }
 0x28a   :  { %954 = vsyncpa [#allocation4 + $0x1], 1 }
 0x28b   :  { %955 = vsyncpa [#allocation10], 1 }
 0x28c   :  { %957 = vsyncpa [#allocation10 + $0x1], 1 }

</bundles_post_ra>
